<compile_context>
chip_gen: v5e
topology: v5e:2x2
jax: 0.10.0
libtpu: 0.0.40
codegen_flags: <defaults>
</compile_context>

<pallas_src>
import jax
import jax.numpy as jnp
import numpy as np
from jax import lax
from jax.experimental import pallas as pl
from jax.experimental.pallas import tpu as pltpu


def _cross_taps(mask_range: int):
    """Tap offsets (di, dj) and weights of the cross kernel from
    mass.generate_mask() (identical for every class).  Returns
    ([((di, dj), weight), ...], s) with s = sum of all weights."""
    R = mask_range
    p = (R - 1) // 2
    base = lambda d: float((R - 1) ** 2 + 1 - d * d)
    taps = [((0, dj), base(abs(dj))) for dj in range(-p, p + 1)]
    taps += [((di, 0), base(abs(di))) for di in range(-p, p + 1) if di != 0]
    s_val = sum(w for _, w in taps)
    return taps, s_val


def _build_tap_weights(H, W, HWp, mask_range):
    """Trace-time constants: per-tap lane-weight vectors with the conv's
    zero-padding (border validity), the 1/s normalisation and the spatial-pad
    zeros all baked in.  Shape (n_taps, HWp) f32, plus the flat lane shifts."""
    taps, s_val = _cross_taps(mask_range)
    HW = H * W
    rows = np.arange(HW) // W
    cols = np.arange(HW) % W
    tapw = np.zeros((len(taps), HWp), dtype=np.float32)
    shifts = []
    for t, ((di, dj), w) in enumerate(taps):
        valid = np.ones(HW, dtype=bool)
        if di > 0:
            valid &= rows < (H - di)
        elif di < 0:
            valid &= rows >= -di
        if dj > 0:
            valid &= cols < (W - dj)
        elif dj < 0:
            valid &= cols >= -dj
        tapw[t, :HW] = np.where(valid, np.float32(w / s_val), np.float32(0.0))
        shifts.append(di * W + dj)
    return jnp.asarray(tapw), tuple(shifts)


def _make_mass_kernel(C, HWp, Bt, tap_shifts):
    n_taps = len(tap_shifts)

    def kernel(x_ref, lab_ref, tapw_ref, out_ref):
        # x_ref/lab_ref: (Bt, C, HWp); tapw_ref: (n_taps, HWp);
        # out_ref: (Bt, C+1, HWp); lanes = HWp (dense, multiple of 128).
        x = x_ref[...].astype(jnp.float32)
        lab = lab_ref[...].astype(jnp.float32)

        # ---- channel argmax (first max wins), on pre-softmax x so the VPU
        # compare/select work overlaps the EUP exp chain ----------------------
        xmax = jnp.max(x, axis=1, keepdims=True)                       # (Bt,1,HWp)
        cls = lax.broadcasted_iota(jnp.int32, (1, C, HWp), 1).astype(jnp.float32)
        first = jnp.min(jnp.where(x == xmax, cls, jnp.float32(C)),
                        axis=1, keepdims=True)                         # (Bt,1,HWp)
        is_sel = cls == first                                          # (Bt,C,HWp)

        # ---- softmax over channels (sublane axis) ----------------------------
        e = jnp.exp(x - xmax)
        denom = jnp.sum(e, axis=1, keepdims=True)
        inv = pl.reciprocal(denom, approx=True)        # EUP slot
        inv = inv * (2.0 - denom * inv)                # 1 Newton step -> ~f32 exact
        prob = e * inv

        # ---- cross depthwise conv: XLU lane rolls + constant tap weights -----
        # (validity masks for zero-padding and the 1/s factor are baked into
        #  the tapw constants; each tap = 1 roll + 1 FMA for all classes.)
        agg = jnp.zeros_like(lab)
        for t in range(n_taps):
            w = tapw_ref[t, :].reshape(1, 1, HWp)
            s = tap_shifts[t]
            shifted = lab if s == 0 else pltpu.roll(lab, shift=(-s) % HWp, axis=2)
            agg = agg + w * shifted

        # ---- reweight winning class + residual mass channel ------------------
        refined = prob * jnp.where(is_sel, agg, jnp.float32(1.0))
        out_ref[:, :C, :] = refined.astype(out_ref.dtype)
        out_ref[:, C:C + 1, :] = (
            1.0 - jnp.sum(refined, axis=1, keepdims=True)).astype(out_ref.dtype)

    return kernel


def _choose_batch_block(b, C, HWp, in_itemsize, out_itemsize):
    """Images per grid step.

    Sizing rules (per perf review):
      * amortize the ~0.35 us per-step pipeline overhead: target ~4 MiB of
        streamed bytes (x + label + out) per step;
      * account for 2x double-buffered streamed blocks plus ~3x live f32
        intermediates (prob/agg/refined/masks) and keep the total under a
        ~24 MiB VMEM budget (explicit vmem_limit_bytes is set at the call);
      * only create >=2 'parallel' steps (useful only for v7x's two
        TensorCores) when each step still carries >= ~1 MiB; small batches
        (like the b=2 demo) run as a single grid step.
    """
    io_per_img = (2 * C * in_itemsize + (C + 1) * out_itemsize) * HWp
    TARGET_IO = 4 << 20
    VMEM_BUDGET = 24 << 20
    cap = min(max(1, TARGET_IO // io_per_img),
              max(1, VMEM_BUDGET // (5 * io_per_img)),
              b)
    if b >= 2 and b * io_per_img >= (2 << 20):
        cap = min(cap, max(1, b // 2))
    bt = 1
    for d in range(1, int(cap) + 1):   # largest divisor of b within the cap
        if b % d == 0:
            bt = d
    return bt


def mass_forward(x, label, mask_range: int, num_classes: int,
                 out_dtype=jnp.float32):
    """Pallas equivalent of mass(mask_range, num_classes).forward(x, label).

    x, label: (B, C, H, W); any float dtype (bf16 inputs halve HBM traffic,
    all in-kernel math stays f32).  Output: (B, C+1, H, W) in `out_dtype`.
    """
    b, C, H, W = x.shape
    assert C == num_classes and label.shape == x.shape
    assert mask_range % 2 == 1, "mask_range must be odd (as in the reference)"
    HW = H * W
    HWp = ((HW + 127) // 128) * 128   # lane-dense slabs -> unmasked full-lane vst

    # Free (contiguous) reshape to flatten spatial; pad lanes only if needed.
    x_flat = x.reshape(b, C, HW)
    lab_flat = label.reshape(b, C, HW)
    if HWp != HW:
        pad = [(0, 0), (0, 0), (0, HWp - HW)]
        x_flat = jnp.pad(x_flat, pad)
        lab_flat = jnp.pad(lab_flat, pad)

    tapw, tap_shifts = _build_tap_weights(H, W, HWp, mask_range)

    Bt = _choose_batch_block(b, C, HWp, x.dtype.itemsize,
                             jnp.dtype(out_dtype).itemsize)
    grid = (b // Bt,)

    kernel = _make_mass_kernel(C, HWp, Bt, tap_shifts)

    out = pl.pallas_call(
        kernel,
        out_shape=jax.ShapeDtypeStruct((b, C + 1, HWp), out_dtype),
        grid=grid,
        in_specs=[
            pl.BlockSpec((Bt, C, HWp), lambda i: (i, 0, 0)),
            pl.BlockSpec((Bt, C, HWp), lambda i: (i, 0, 0)),
            pl.BlockSpec((tapw.shape[0], HWp), lambda i: (0, 0)),
        ],
        out_specs=pl.BlockSpec((Bt, C + 1, HWp), lambda i: (i, 0, 0)),
        compiler_params=pltpu.CompilerParams(
            dimension_semantics=("parallel",),
            vmem_limit_bytes=32 << 20,
        ),
    )(x_flat, lab_flat, tapw)

    if HWp != HW:
        out = out[:, :, :HW]
    return out.reshape(b, C + 1, H, W)


if __name__ == "__main__":
    mask_range = 5
    num_classes = 4
    b, H, W = 2, 16, 16

    key = jax.random.PRNGKey(0)
    kx, kl = jax.random.split(key)

    # x: pre-softmax class logits; label: soft per-class map
    x = jax.random.normal(kx, (b, num_classes, H, W), dtype=jnp.float32)
    label = jax.nn.softmax(
        jax.random.normal(kl, (b, num_classes, H, W), dtype=jnp.float32),
        axis=1)

    out = mass_forward(x, label, mask_range, num_classes)
    out = jax.block_until_ready(out)
    assert out.shape == (b, num_classes + 1, H, W)
    print("KERNEL_OK")
</pallas_src>

<mosaic_0001>
module attributes {stable_mosaic.version = 11 : i64} {
  func.func @kernel(%arg0: i32, %arg1: memref<2x4x256xf32, #tpu.memory_space<vmem>>, %arg2: memref<2x4x256xf32, #tpu.memory_space<vmem>>, %arg3: memref<9x256xf32, #tpu.memory_space<vmem>>, %arg4: memref<2x5x256xf32, #tpu.memory_space<vmem>>) attributes {dimension_semantics = [#tpu.dimension_semantics<parallel>], iteration_bounds = array<i64: 1>, scalar_prefetch = 0 : i64, scratch_operands = 0 : i64, tpu.core_type = #tpu.core_type<tc>, window_params = [{transform_indices = @transform_0, window_bounds = array<i64: 2, 4, 256>}, {transform_indices = @transform_1, window_bounds = array<i64: 2, 4, 256>}, {pipeline_mode = #tpu.pipeline_mode<synchronous>, transform_indices = @transform_2, window_bounds = array<i64: 9, 256>}, {transform_indices = @transform_3, window_bounds = array<i64: 2, 5, 256>}]} {
    %c0 = arith.constant 0 : index
    %c0_0 = arith.constant 0 : index
    %c0_1 = arith.constant 0 : index
    %0 = vector.load %arg1[%c0, %c0_0, %c0_1] : memref<2x4x256xf32, #tpu.memory_space<vmem>>, vector<2x4x256xf32>
    %c0_2 = arith.constant 0 : index
    %c0_3 = arith.constant 0 : index
    %c0_4 = arith.constant 0 : index
    %1 = vector.load %arg2[%c0_2, %c0_3, %c0_4] : memref<2x4x256xf32, #tpu.memory_space<vmem>>, vector<2x4x256xf32>
    %cst = arith.constant dense<0xFF800000> : vector<2x256xf32>
    %2 = vector.multi_reduction <maximumf>, %0, %cst [1] : vector<2x4x256xf32> to vector<2x256xf32>
    %3 = vector.shape_cast %2 : vector<2x256xf32> to vector<2x1x256xf32>
    %4 = tpu.iota {dimensions = array<i32: 1>} : vector<1x4x256xi32>
    %5 = arith.sitofp %4 : vector<1x4x256xi32> to vector<1x4x256xf32>
    %6 = vector.broadcast %3 : vector<2x1x256xf32> to vector<2x4x256xf32>
    %7 = arith.cmpf oeq, %0, %6 : vector<2x4x256xf32>
    %cst_5 = arith.constant 4.000000e+00 : f32
    %8 = vector.shape_cast %5 : vector<1x4x256xf32> to vector<1x4x256xf32>
    %9 = vector.broadcast %8 : vector<1x4x256xf32> to vector<2x4x256xf32>
    %10 = vector.broadcast %cst_5 : f32 to vector<2x4x256xf32>
    %11 = arith.select %7, %9, %10 : vector<2x4x256xi1>, vector<2x4x256xf32>
    %cst_6 = arith.constant dense<0x7F800000> : vector<2x256xf32>
    %12 = vector.multi_reduction <minimumf>, %11, %cst_6 [1] : vector<2x4x256xf32> to vector<2x256xf32>
    %13 = vector.shape_cast %12 : vector<2x256xf32> to vector<2x1x256xf32>
    %14 = vector.broadcast %5 : vector<1x4x256xf32> to vector<2x4x256xf32>
    %15 = vector.broadcast %13 : vector<2x1x256xf32> to vector<2x4x256xf32>
    %16 = arith.cmpf oeq, %14, %15 : vector<2x4x256xf32>
    %17 = vector.broadcast %3 : vector<2x1x256xf32> to vector<2x4x256xf32>
    %18 = arith.subf %0, %17 : vector<2x4x256xf32>
    %19 = math.exp %18 : vector<2x4x256xf32>
    %cst_7 = arith.constant dense<0.000000e+00> : vector<2x256xf32>
    %20 = vector.multi_reduction <add>, %19, %cst_7 [1] : vector<2x4x256xf32> to vector<2x256xf32>
    %21 = vector.shape_cast %20 : vector<2x256xf32> to vector<2x1x256xf32>
    %22 = tpu.reciprocal %21 {approx = true} : vector<2x1x256xf32> -> vector<2x1x256xf32>
    %23 = arith.mulf %21, %22 : vector<2x1x256xf32>
    %cst_8 = arith.constant 2.000000e+00 : f32
    %24 = vector.broadcast %cst_8 : f32 to vector<2x1x256xf32>
    %25 = arith.subf %24, %23 : vector<2x1x256xf32>
    %26 = arith.mulf %22, %25 : vector<2x1x256xf32>
    %27 = vector.broadcast %26 : vector<2x1x256xf32> to vector<2x4x256xf32>
    %28 = arith.mulf %19, %27 : vector<2x4x256xf32>
    %cst_9 = arith.constant 0.000000e+00 : f32
    %29 = vector.broadcast %cst_9 : f32 to vector<2x4x256xf32>
    %c0_10 = arith.constant 0 : index
    %c0_11 = arith.constant 0 : index
    %30 = vector.load %arg3[%c0_10, %c0_11] : memref<9x256xf32, #tpu.memory_space<vmem>>, vector<1x256xf32>
    %31 = vector.shape_cast %30 : vector<1x256xf32> to vector<256xf32>
    %32 = vector.shape_cast %31 : vector<256xf32> to vector<1x1x256xf32>
    %c2_i32 = arith.constant 2 : i32
    %33 = tpu.dynamic_rotate %1 by %c2_i32 dim 2 : vector<2x4x256xf32>, i32 -> vector<2x4x256xf32>
    %34 = vector.broadcast %32 : vector<1x1x256xf32> to vector<2x4x256xf32>
    %35 = arith.mulf %34, %33 : vector<2x4x256xf32>
    %36 = arith.addf %29, %35 : vector<2x4x256xf32>
    %c1 = arith.constant 1 : index
    %c0_12 = arith.constant 0 : index
    %37 = vector.load %arg3[%c1, %c0_12] : memref<9x256xf32, #tpu.memory_space<vmem>>, vector<1x256xf32>
    %38 = vector.shape_cast %37 : vector<1x256xf32> to vector<256xf32>
    %39 = vector.shape_cast %38 : vector<256xf32> to vector<1x1x256xf32>
    %c1_i32 = arith.constant 1 : i32
    %40 = tpu.dynamic_rotate %1 by %c1_i32 dim 2 : vector<2x4x256xf32>, i32 -> vector<2x4x256xf32>
    %41 = vector.broadcast %39 : vector<1x1x256xf32> to vector<2x4x256xf32>
    %42 = arith.mulf %41, %40 : vector<2x4x256xf32>
    %43 = arith.addf %36, %42 : vector<2x4x256xf32>
    %c2 = arith.constant 2 : index
    %c0_13 = arith.constant 0 : index
    %44 = vector.load %arg3[%c2, %c0_13] : memref<9x256xf32, #tpu.memory_space<vmem>>, vector<1x256xf32>
    %45 = vector.shape_cast %44 : vector<1x256xf32> to vector<256xf32>
    %46 = vector.shape_cast %45 : vector<256xf32> to vector<1x1x256xf32>
    %47 = vector.broadcast %46 : vector<1x1x256xf32> to vector<2x4x256xf32>
    %48 = arith.mulf %47, %1 : vector<2x4x256xf32>
    %49 = arith.addf %43, %48 : vector<2x4x256xf32>
    %c3 = arith.constant 3 : index
    %c0_14 = arith.constant 0 : index
    %50 = vector.load %arg3[%c3, %c0_14] : memref<9x256xf32, #tpu.memory_space<vmem>>, vector<1x256xf32>
    %51 = vector.shape_cast %50 : vector<1x256xf32> to vector<256xf32>
    %52 = vector.shape_cast %51 : vector<256xf32> to vector<1x1x256xf32>
    %c255_i32 = arith.constant 255 : i32
    %53 = tpu.dynamic_rotate %1 by %c255_i32 dim 2 : vector<2x4x256xf32>, i32 -> vector<2x4x256xf32>
    %54 = vector.broadcast %52 : vector<1x1x256xf32> to vector<2x4x256xf32>
    %55 = arith.mulf %54, %53 : vector<2x4x256xf32>
    %56 = arith.addf %49, %55 : vector<2x4x256xf32>
    %c4 = arith.constant 4 : index
    %c0_15 = arith.constant 0 : index
    %57 = vector.load %arg3[%c4, %c0_15] : memref<9x256xf32, #tpu.memory_space<vmem>>, vector<1x256xf32>
    %58 = vector.shape_cast %57 : vector<1x256xf32> to vector<256xf32>
    %59 = vector.shape_cast %58 : vector<256xf32> to vector<1x1x256xf32>
    %c254_i32 = arith.constant 254 : i32
    %60 = tpu.dynamic_rotate %1 by %c254_i32 dim 2 : vector<2x4x256xf32>, i32 -> vector<2x4x256xf32>
    %61 = vector.broadcast %59 : vector<1x1x256xf32> to vector<2x4x256xf32>
    %62 = arith.mulf %61, %60 : vector<2x4x256xf32>
    %63 = arith.addf %56, %62 : vector<2x4x256xf32>
    %c5 = arith.constant 5 : index
    %c0_16 = arith.constant 0 : index
    %64 = vector.load %arg3[%c5, %c0_16] : memref<9x256xf32, #tpu.memory_space<vmem>>, vector<1x256xf32>
    %65 = vector.shape_cast %64 : vector<1x256xf32> to vector<256xf32>
    %66 = vector.shape_cast %65 : vector<256xf32> to vector<1x1x256xf32>
    %c32_i32 = arith.constant 32 : i32
    %67 = tpu.dynamic_rotate %1 by %c32_i32 dim 2 : vector<2x4x256xf32>, i32 -> vector<2x4x256xf32>
    %68 = vector.broadcast %66 : vector<1x1x256xf32> to vector<2x4x256xf32>
    %69 = arith.mulf %68, %67 : vector<2x4x256xf32>
    %70 = arith.addf %63, %69 : vector<2x4x256xf32>
    %c6 = arith.constant 6 : index
    %c0_17 = arith.constant 0 : index
    %71 = vector.load %arg3[%c6, %c0_17] : memref<9x256xf32, #tpu.memory_space<vmem>>, vector<1x256xf32>
    %72 = vector.shape_cast %71 : vector<1x256xf32> to vector<256xf32>
    %73 = vector.shape_cast %72 : vector<256xf32> to vector<1x1x256xf32>
    %c16_i32 = arith.constant 16 : i32
    %74 = tpu.dynamic_rotate %1 by %c16_i32 dim 2 : vector<2x4x256xf32>, i32 -> vector<2x4x256xf32>
    %75 = vector.broadcast %73 : vector<1x1x256xf32> to vector<2x4x256xf32>
    %76 = arith.mulf %75, %74 : vector<2x4x256xf32>
    %77 = arith.addf %70, %76 : vector<2x4x256xf32>
    %c7 = arith.constant 7 : index
    %c0_18 = arith.constant 0 : index
    %78 = vector.load %arg3[%c7, %c0_18] : memref<9x256xf32, #tpu.memory_space<vmem>>, vector<1x256xf32>
    %79 = vector.shape_cast %78 : vector<1x256xf32> to vector<256xf32>
    %80 = vector.shape_cast %79 : vector<256xf32> to vector<1x1x256xf32>
    %c240_i32 = arith.constant 240 : i32
    %81 = tpu.dynamic_rotate %1 by %c240_i32 dim 2 : vector<2x4x256xf32>, i32 -> vector<2x4x256xf32>
    %82 = vector.broadcast %80 : vector<1x1x256xf32> to vector<2x4x256xf32>
    %83 = arith.mulf %82, %81 : vector<2x4x256xf32>
    %84 = arith.addf %77, %83 : vector<2x4x256xf32>
    %c8 = arith.constant 8 : index
    %c0_19 = arith.constant 0 : index
    %85 = vector.load %arg3[%c8, %c0_19] : memref<9x256xf32, #tpu.memory_space<vmem>>, vector<1x256xf32>
    %86 = vector.shape_cast %85 : vector<1x256xf32> to vector<256xf32>
    %87 = vector.shape_cast %86 : vector<256xf32> to vector<1x1x256xf32>
    %c224_i32 = arith.constant 224 : i32
    %88 = tpu.dynamic_rotate %1 by %c224_i32 dim 2 : vector<2x4x256xf32>, i32 -> vector<2x4x256xf32>
    %89 = vector.broadcast %87 : vector<1x1x256xf32> to vector<2x4x256xf32>
    %90 = arith.mulf %89, %88 : vector<2x4x256xf32>
    %91 = arith.addf %84, %90 : vector<2x4x256xf32>
    %cst_20 = arith.constant 1.000000e+00 : f32
    %92 = vector.broadcast %cst_20 : f32 to vector<2x4x256xf32>
    %93 = arith.select %16, %91, %92 : vector<2x4x256xi1>, vector<2x4x256xf32>
    %94 = arith.mulf %28, %93 : vector<2x4x256xf32>
    %c0_21 = arith.constant 0 : index
    %c0_22 = arith.constant 0 : index
    %c0_23 = arith.constant 0 : index
    %95 = vector.load %arg4[%c0_21, %c0_22, %c0_23] : memref<2x5x256xf32, #tpu.memory_space<vmem>>, vector<2x4x256xf32>
    tpu.vector_store %arg4[%c0_21, %c0_22, %c0_23], %94 {strides = array<i32>} : memref<2x5x256xf32, #tpu.memory_space<vmem>>, vector<2x4x256xf32>,
    %cst_24 = arith.constant dense<0.000000e+00> : vector<2x256xf32>
    %96 = vector.multi_reduction <add>, %94, %cst_24 [1] : vector<2x4x256xf32> to vector<2x256xf32>
    %97 = vector.shape_cast %96 : vector<2x256xf32> to vector<2x1x256xf32>
    %cst_25 = arith.constant 1.000000e+00 : f32
    %98 = vector.broadcast %cst_25 : f32 to vector<2x1x256xf32>
    %99 = arith.subf %98, %97 : vector<2x1x256xf32>
    %c0_26 = arith.constant 0 : index
    %c4_27 = arith.constant 4 : index
    %c0_28 = arith.constant 0 : index
    %100 = vector.load %arg4[%c0_26, %c4_27, %c0_28] : memref<2x5x256xf32, #tpu.memory_space<vmem>>, vector<2x1x256xf32>
    tpu.vector_store %arg4[%c0_26, %c4_27, %c0_28], %99 {strides = array<i32>} : memref<2x5x256xf32, #tpu.memory_space<vmem>>, vector<2x1x256xf32>,
    return
  }
  func.func @transform_0(%arg0: i32) -> (i32, i32, i32) {
    %c0_i32 = arith.constant 0 : i32
    %c0_i32_0 = arith.constant 0 : i32
    %c0_i32_1 = arith.constant 0 : i32
    return %arg0, %c0_i32, %c0_i32_0 : i32, i32, i32
  }
  func.func @transform_1(%arg0: i32) -> (i32, i32, i32) {
    %c0_i32 = arith.constant 0 : i32
    %c0_i32_0 = arith.constant 0 : i32
    %c0_i32_1 = arith.constant 0 : i32
    return %arg0, %c0_i32, %c0_i32_0 : i32, i32, i32
  }
  func.func @transform_2(%arg0: i32) -> (i32, i32) {
    %c0_i32 = arith.constant 0 : i32
    %c0_i32_0 = arith.constant 0 : i32
    %c0_i32_1 = arith.constant 0 : i32
    return %c0_i32, %c0_i32_0 : i32, i32
  }
  func.func @transform_3(%arg0: i32) -> (i32, i32, i32) {
    %c0_i32 = arith.constant 0 : i32
    %c0_i32_0 = arith.constant 0 : i32
    %c0_i32_1 = arith.constant 0 : i32
    return %arg0, %c0_i32, %c0_i32_0 : i32, i32, i32
  }
}

</mosaic_0001>

<bundles_post_ra>
// kernel: tpu_custom_call.1
= control target key start
LH: loop header
LB: loop body
LE: loop exit
PB: predicated region body
PF: predicated region fallthrough
CT: control target
= control target key end

     0   :  { %8 = vsyncpa [#allocation3], 0  ;;  %s1166_s0 = inlined_call_operand.hbm [shape: f32[2,4,256], index: 0, kind: input, shape index: {}]   ;;  %s1167_s1 = inlined_call_operand.hbm [shape: f32[2,4,256], index: 1, kind: input, shape index: {}]   ;;  %s1168_s2 = inlined_call_operand.hbm [shape: f32[9,256], index: 2, kind: input, shape index: {}]   ;;  %s1169_s3 = inlined_call_operand.vmem [shape: f32[2,5,256], index: 3, kind: output, shape index: {}]  }
   0x1   :  { %9 = vsyncpa [#allocation5], 0  ;;  %s27_s14 = sshll.u32 %s1167_s1, 4  ;;  %s799_s15 = smov [#allocation4]   ;;  %s28_s14 = int_to_ptr.hbm [resolvable:$true] %s27_s14 }
   0x2   :  { %s29_s16 = sshll.u32 %s799_s15, 4  ;;  %s14_s19 = sshll.u32 %s1166_s0, 4  ;;  %s30_s16 = int_to_ptr.vmem [resolvable:$true] %s29_s16  ;;  %s15_s19 = int_to_ptr.hbm [resolvable:$true] %s14_s19 }
   0x3   :  { %s800_s20 = smov 128   ;;  %s801_s21 = smov 8  }
   0x4   :  { %35 = dma.hbm_to_vmem [thread:$0]  %s28_s14, 256, %s30_s16, [#allocation5], %s800_s20, %s800_s20, %s801_s21  }
   0x5   :  { %s802_s22 = smov [#allocation2]   ;;  %s40_s26 = sshll.u32 %s1168_s2, 4  ;;  %s41_s26 = int_to_ptr.hbm [resolvable:$true] %s40_s26 }
   0x6   :  { %s16_s23 = sshll.u32 %s802_s22, 4  ;;  %s803_s1 = smov [#allocation6]   ;;  %s17_s23 = int_to_ptr.vmem [resolvable:$true] %s16_s23 }
   0x7   :  { %22 = dma.hbm_to_vmem [thread:$0]  %s15_s19, 256, %s17_s23, [#allocation3], %s800_s20, %s800_s20, %s801_s21  }
   0x8   :  { %s42_s27 = sshll.u32 %s803_s1, 4  ;;  %s804_s28 = smov 256   ;;  %s43_s27 = int_to_ptr.vmem [resolvable:$true] %s42_s27 }
   0x9   :  { %s805_s29 = smov 16  }
   0xa   :  { %48 = dma.hbm_to_vmem [thread:$0]  %s41_s26, 512, %s43_s27, [#allocation5], %s804_s28, %s804_s28, %s805_s29  }
   0xb   :  { %795 = dma.done.wait [#allocation3], 256  }
   0xc   :  { %796 = vsyncadd [#allocation3], 4294967040 }
   0xd   :  { %797 = dma.done.wait [#allocation5], 768  }
   0xe   :  { %798 = vsyncadd [#allocation5], 4294966528  ;;  %v61_v0 = vld [vmem:[#allocation2] sm:$0xff]  ;;  %v62_v1 = vld [vmem:[#allocation2 + $0x8] sm:$0xff]  ;;  %vm78_vm0 = vcmask 1043456   ;;  %v107_v9 = vlaneseq  ;;  %s807_s0 = smov 2  }
   0xf   :  { %67 = vst [vmem:[#allocation1] ss:$2 sm:$0xff] %v61_v0  ;;  %v806_v17 = vmov 839922192   ;;  %v868_v57 = vld [vmem:[#allocation4] sm:$0xff]  ;;  %v870_v58 = vld [vmem:[#allocation4 + $0x8] sm:$0xff] }
  0x10   :  { %71 = vst [vmem:[#allocation1 + $0x10] ss:$2 sm:$0xff] %v62_v1  ;;  %v124_v18 = vunpack.c.l.s4 %v806_v17  ;;  %v108_v22 = vshrl.u32 %v107_v9, 7  ;;  %s808_s2 = smov 1   ;;  %s809_s30 = smov 127   ;;  %vm673_vm15 = vcmask 1040384  }
  0x11   :  { %s810_s4 = smov 126   ;;  %s811_s5 = smov 32  }
  0x12   :  { %v125_v28 = vunpack.c.0.s8 %v124_v18  ;;  %v849_v32 = vcvt.s32.f32 %v108_v22  ;;  %s812_s6 = smov 112   ;;  %s813_s7 = smov 96  }
  0x14   :  { %v126_v39 = vperm.slane %v849_v32, %v125_v28 }
  0x16   :  { %v68_v2 = vld.sshfl [vmem:[#allocation1] sm:$0xff pattern:$0x75316420]  ;;  %v69_v3 = vld.sshfl [vmem:[#allocation1 + $0x8] sm:$0xff pattern:$0x75316420] }
  0x17   :  { %v79_v4 = vsel %vm78_vm0, %v68_v2, -inf  ;;  %v86_v5 = vsel %vm78_vm0, %v69_v3, -inf  ;;  %v72_v6 = vld.sshfl [vmem:[#allocation1 + $0x10] sm:$0xff pattern:$0x75316420] }
  0x18   :  { %v80_v7 = vrot.slane %v79_v4, 4  ;;  %v87_v8 = vrot.slane %v86_v5, 4  ;;  %v73_v10 = vld.sshfl [vmem:[#allocation1 + $0x18] sm:$0xff pattern:$0x75316420]  ;;  %v93_v11 = vsel %vm78_vm0, %v72_v6, -inf }
  0x19   :  { %v94_v12 = vrot.slane %v93_v11, 4  ;;  %v100_v13 = vsel %vm78_vm0, %v73_v10, -inf }
  0x1a   :  { %v81_v14 = vmax.f32 %v79_v4, %v80_v7  ;;  %v88_v15 = vmax.f32 %v86_v5, %v87_v8  ;;  %v101_v16 = vrot.slane %v100_v13, 4 }
  0x1b   :  { %v95_v19 = vmax.f32 %v93_v11, %v94_v12 }
  0x1c   :  { %v82_v20 = vrot.slane %v81_v14, 2  ;;  %v89_v21 = vrot.slane %v88_v15, 2  ;;  %v102_v23 = vmax.f32 %v100_v13, %v101_v16 }
  0x1d   :  { %v96_v24 = vrot.slane %v95_v19, 2 }
  0x1e   :  { %v83_v25 = vmax.f32 %v81_v14, %v82_v20  ;;  %v90_v26 = vmax.f32 %v88_v15, %v89_v21  ;;  %v103_v27 = vrot.slane %v102_v23, 2 }
  0x1f   :  { %v97_v29 = vmax.f32 %v95_v19, %v96_v24 }
  0x20   :  { %v84_v30 = vrot.slane %v83_v25, 1  ;;  %v91_v31 = vrot.slane %v90_v26, 1  ;;  %v104_v33 = vmax.f32 %v102_v23, %v103_v27 }
  0x21   :  { %v98_v34 = vrot.slane %v97_v29, 1 }
  0x22   :  { %v85_v35 = vmax.f32 %v83_v25, %v84_v30  ;;  %v92_v36 = vmax.f32 %v90_v26, %v91_v31  ;;  %v105_v37 = vrot.slane %v104_v33, 1 }
  0x23   :  { %v99_v40 = vmax.f32 %v97_v29, %v98_v34 }
  0x24   :  { %v114_v38 = vrot.slane %v92_v36, 4  ;;  %v106_v41 = vmax.f32 %v104_v33, %v105_v37 }
  0x26   :  { %v116_v42 = vsel %vm78_vm0, %v85_v35, %v114_v38  ;;  %v115_v43 = vrot.slane %v106_v41, 4  ;;  %v911_v38 = vand.u32 127, %v107_v9 }
  0x27   :  { %vm120_vm1 = vcmp.eq.f32.partialorder %v61_v0, %v116_v42  ;;  %v175_v44 = vsub.f32 %v61_v0, %v116_v42 }
  0x28   :  { %v128_v45 = vsel %vm120_vm1, %v126_v39, 4.0  ;;  %v117_v46 = vsel %vm78_vm0, %v99_v40, %v115_v43  ;;  %vm274_vm3 = vcmp.lt.s32.totalorder %v911_v38, 2  ;;  %vm313_vm4 = vcmp.lt.s32.totalorder %v911_v38, 1 }
  0x29   :  { %132 = vst [vmem:[#allocation1] ss:$2 sm:$0xff] %v128_v45  ;;  %v177_v47 = vmul.f32 1.442695, %v175_v44  ;;  %vm121_vm2 = vcmp.eq.f32.partialorder %v62_v1, %v117_v46  ;;  %v176_v48 = vsub.f32 %v62_v1, %v117_v46  ;;  %vm378_vm5 = vcmp.lt.s32.totalorder %v911_v38, 127 }
  0x2a   :  { %v129_v49 = vsel %vm121_vm2, %v126_v39, 4.0  ;;  %vm417_vm6 = vcmp.lt.s32.totalorder %v911_v38, 126  ;;  %vm456_vm7 = vcmp.lt.s32.totalorder %v911_v38, 32  ;;  %vm495_vm8 = vcmp.lt.s32.totalorder %v911_v38, 16 }
  0x2b   :  { %711 = vpow2.f32 %v177_v47  ;;  %136 = vst [vmem:[#allocation1 + $0x10] ss:$2 sm:$0xff] %v129_v49  ;;  %v179_v50 = vmul.f32 1.442695, %v176_v48  ;;  %vm534_vm9 = vcmp.lt.s32.totalorder %v911_v38, 112  ;;  %vm573_vm10 = vcmp.lt.s32.totalorder %v911_v38, 96 }
  0x2d   :  { %713 = vpow2.f32 %v179_v50 }
  0x30   :  { %v854_v51 = vld.sshfl [vmem:[#allocation1] sm:$0xff pattern:$0x75316420]  ;;  %v856_v52 = vld.sshfl [vmem:[#allocation1 + $0x8] sm:$0xff pattern:$0x75316420] }
  0x31   :  { %v858_v53 = vpop.eup %711 }
  0x32   :  { %183 = vst [vmem:[#allocation1] ss:$2 sm:$0xff] %v858_v53  ;;  %v861_v54 = vld.sshfl [vmem:[#allocation1 + $0x10] sm:$0xff pattern:$0x75316420] }
  0x33   :  { %v863_v55 = vpop.eup %713  ;;  %v865_v56 = vld.sshfl [vmem:[#allocation1 + $0x18] sm:$0xff pattern:$0x75316420] }
  0x34   :  { %187 = vst [vmem:[#allocation1 + $0x10] ss:$2 sm:$0xff] %v863_v55 }
  0x39   :  { %v872_v59 = vld.sshfl [vmem:[#allocation1] sm:$0xff pattern:$0x75316420]  ;;  %v874_v60 = vld.sshfl [vmem:[#allocation1 + $0x8] sm:$0xff pattern:$0x75316420] }
  0x3a   :  { %253 = vst [vmem:[#allocation1] ss:$2 sm:$0xff] %v868_v57 }
  0x3b   :  { %v877_v61 = vld.sshfl [vmem:[#allocation1 + $0x10] sm:$0xff pattern:$0x75316420]  ;;  %v879_v62 = vld.sshfl [vmem:[#allocation1 + $0x18] sm:$0xff pattern:$0x75316420] }
  0x3c   :  { %257 = vst [vmem:[#allocation1 + $0x10] ss:$2 sm:$0xff] %v870_v58 }
  0x41   :  { %v255_v63 = vld.sshfl [vmem:[#allocation1 + $0x8] sm:$0xff pattern:$0x75316420]  ;;  %v254_v0 = vld.sshfl [vmem:[#allocation1] sm:$0xff pattern:$0x75316420] }
  0x42   :  { %268 = vrot.lane.b32.xlu1 %v255_v63, %s807_s0  ;;  %264 = vrot.lane.b32.xlu0 %v254_v0, %s807_s0  ;;  %294 = vst [vmem:[#allocation1] ss:$2 sm:$0xff] %v868_v57 }
  0x43   :  { %v259_v1 = vld.sshfl [vmem:[#allocation1 + $0x18] sm:$0xff pattern:$0x75316420]  ;;  %v258_v2 = vld.sshfl [vmem:[#allocation1 + $0x10] sm:$0xff pattern:$0x75316420] }
  0x44   :  { %298 = vst [vmem:[#allocation1 + $0x10] ss:$2 sm:$0xff] %v870_v58 }
  0x49   :  { %v296_v3 = vld.sshfl [vmem:[#allocation1 + $0x8] sm:$0xff pattern:$0x75316420]  ;;  %v295_v4 = vld.sshfl [vmem:[#allocation1] sm:$0xff pattern:$0x75316420] }
  0x4a   :  { %270 = vrot.lane.b32.xlu1 %v259_v1, %s807_s0  ;;  %266 = vrot.lane.b32.xlu0 %v258_v2, %s807_s0  ;;  %338 = vst [vmem:[#allocation1] ss:$2 sm:$0xff] %v868_v57  ;;  %v215_v1 = vsel %vm78_vm0, %v879_v62, 0.0 }
  0x4b   :  { %v299_v5 = vld.sshfl [vmem:[#allocation1 + $0x10] sm:$0xff pattern:$0x75316420]  ;;  %v300_v6 = vld.sshfl [vmem:[#allocation1 + $0x18] sm:$0xff pattern:$0x75316420]  ;;  %305 = vrot.lane.b32.xlu2 %v295_v4, %s808_s2 }
  0x4c   :  { %342 = vst [vmem:[#allocation1 + $0x10] ss:$2 sm:$0xff] %v870_v58  ;;  %v332_v4 = vld [vmem:[#allocation6 + $0x2] ss:$8 sm:$0x3] }
  0x51   :  { %v886_v7 = vld.sshfl [vmem:[#allocation1] sm:$0xff pattern:$0x75316420]  ;;  %v888_v8 = vld.sshfl [vmem:[#allocation1 + $0x8] sm:$0xff pattern:$0x75316420] }
  0x52   :  { %311 = vrot.lane.b32.xlu1 %v300_v6, %s808_s2  ;;  %309 = vrot.lane.b32.xlu0 %v296_v3, %s808_s2  ;;  %359 = vst [vmem:[#allocation1] ss:$2 sm:$0xff] %v868_v57  ;;  %v216_v6 = vrot.slane %v215_v1, 4 }
  0x53   :  { %v891_v10 = vld.sshfl [vmem:[#allocation1 + $0x10] sm:$0xff pattern:$0x75316420]  ;;  %v893_v11 = vld.sshfl [vmem:[#allocation1 + $0x18] sm:$0xff pattern:$0x75316420]  ;;  %307 = vrot.lane.b32.xlu2 %v299_v5, %s808_s2 }
  0x54   :  { %363 = vst [vmem:[#allocation1 + $0x10] ss:$2 sm:$0xff] %v870_v58  ;;  %v194_v5 = vsel %vm78_vm0, %v872_v59, 0.0 }
  0x55   :  { %v195_v62 = vrot.slane %v194_v5, 4 }
  0x59   :  { %v361_v12 = vld.sshfl [vmem:[#allocation1 + $0x8] sm:$0xff pattern:$0x75316420]  ;;  %v360_v13 = vld.sshfl [vmem:[#allocation1] sm:$0xff pattern:$0x75316420] }
  0x5a   :  { %374 = vrot.lane.b32.xlu1 %v361_v12, %s809_s30  ;;  %398 = vst [vmem:[#allocation1] ss:$2 sm:$0xff] %v868_v57  ;;  %v293_v12 = vld [vmem:[#allocation6 + $0x1] ss:$8 sm:$0x3] }
  0x5b   :  { %v364_v14 = vld.sshfl [vmem:[#allocation1 + $0x10] sm:$0xff pattern:$0x75316420]  ;;  %v365_v15 = vld.sshfl [vmem:[#allocation1 + $0x18] sm:$0xff pattern:$0x75316420]  ;;  %370 = vrot.lane.b32.xlu2 %v360_v13, %s809_s30 }
  0x5c   :  { %372 = vrot.lane.b32.xlu0 %v364_v14, %s809_s30  ;;  %402 = vst [vmem:[#allocation1 + $0x10] ss:$2 sm:$0xff] %v870_v58  ;;  %v250_v14 = vld [vmem:[#allocation6] ss:$8 sm:$0x3] }
  0x61   :  { %v400_v16 = vld.sshfl [vmem:[#allocation1 + $0x8] sm:$0xff pattern:$0x75316420]  ;;  %v399_v17 = vld.sshfl [vmem:[#allocation1] sm:$0xff pattern:$0x75316420] }
  0x62   :  { %437 = vst [vmem:[#allocation1] ss:$2 sm:$0xff] %v868_v57 }
  0x63   :  { %v403_v18 = vld.sshfl [vmem:[#allocation1 + $0x10] sm:$0xff pattern:$0x75316420]  ;;  %v404_v19 = vld.sshfl [vmem:[#allocation1 + $0x18] sm:$0xff pattern:$0x75316420]  ;;  %376 = vrot.lane.b32.xlu2 %v365_v15, %s809_s30 }
  0x64   :  { %411 = vrot.lane.b32.xlu1 %v403_v18, %s810_s4  ;;  %409 = vrot.lane.b32.xlu0 %v399_v17, %s810_s4  ;;  %441 = vst [vmem:[#allocation1 + $0x10] ss:$2 sm:$0xff] %v870_v58  ;;  %v334_v15 = vperm.slane %v332_v4, 0  ;;  %v320_v17 = vperm.slane %v293_v12, 1 }
  0x69   :  { %v438_v20 = vld.sshfl [vmem:[#allocation1] sm:$0xff pattern:$0x75316420]  ;;  %v439_v21 = vld.sshfl [vmem:[#allocation1 + $0x8] sm:$0xff pattern:$0x75316420] }
  0x6a   :  { %476 = vst [vmem:[#allocation1] ss:$2 sm:$0xff] %v868_v57 }
  0x6b   :  { %v442_v22 = vld.sshfl [vmem:[#allocation1 + $0x10] sm:$0xff pattern:$0x75316420]  ;;  %v443_v23 = vld.sshfl [vmem:[#allocation1 + $0x18] sm:$0xff pattern:$0x75316420]  ;;  %413 = vrot.lane.b32.xlu2 %v400_v16, %s810_s4 }
  0x6c   :  { %415 = vrot.lane.b32.xlu0 %v404_v19, %s810_s4  ;;  %448 = vrot.lane.b32.xlu1 %v438_v20, %s811_s5  ;;  %480 = vst [vmem:[#allocation1 + $0x10] ss:$2 sm:$0xff] %v870_v58  ;;  %v335_v16 = vperm.slane %v332_v4, 1  ;;  %v217_v19 = vadd.f32 %v216_v6, %v215_v1  ;;  %v280_v20 = vperm.slane %v250_v14, 0 }
  0x6d   :  { %v970_v4 = vld [vmem:[#allocation6 + $0x5] ss:$8 sm:$0x3] }
  0x71   :  { %v477_v24 = vld.sshfl [vmem:[#allocation1] sm:$0xff pattern:$0x75316420]  ;;  %v478_v25 = vld.sshfl [vmem:[#allocation1 + $0x8] sm:$0xff pattern:$0x75316420] }
  0x72   :  { %515 = vst [vmem:[#allocation1] ss:$2 sm:$0xff] %v868_v57 }
  0x73   :  { %v482_v26 = vld.sshfl [vmem:[#allocation1 + $0x18] sm:$0xff pattern:$0x75316420]  ;;  %v481_v27 = vld.sshfl [vmem:[#allocation1 + $0x10] sm:$0xff pattern:$0x75316420]  ;;  %450 = vrot.lane.b32.xlu2 %v442_v22, %s811_s5 }
  0x74   :  { %452 = vrot.lane.b32.xlu0 %v439_v21, %s811_s5  ;;  %454 = vrot.lane.b32.xlu1 %v443_v23, %s811_s5  ;;  %519 = vst [vmem:[#allocation1 + $0x10] ss:$2 sm:$0xff] %v870_v58  ;;  %v319_v21 = vperm.slane %v293_v12, 0 }
  0x79   :  { %v517_v28 = vld.sshfl [vmem:[#allocation1 + $0x8] sm:$0xff pattern:$0x75316420]  ;;  %v516_v29 = vld.sshfl [vmem:[#allocation1] sm:$0xff pattern:$0x75316420] }
  0x7a   :  { %554 = vst [vmem:[#allocation1] ss:$2 sm:$0xff] %v868_v57 }
  0x7b   :  { %v520_v30 = vld.sshfl [vmem:[#allocation1 + $0x10] sm:$0xff pattern:$0x75316420]  ;;  %487 = vrot.lane.b32.xlu2 %v477_v24, %s805_s29  ;;  %v521_v31 = vld.sshfl [vmem:[#allocation1 + $0x18] sm:$0xff pattern:$0x75316420] }
  0x7c   :  { %489 = vrot.lane.b32.xlu0 %v481_v27, %s805_s29  ;;  %491 = vrot.lane.b32.xlu1 %v478_v25, %s805_s29  ;;  %558 = vst [vmem:[#allocation1 + $0x10] ss:$2 sm:$0xff] %v870_v58  ;;  %v201_v58 = vsel %vm78_vm0, %v874_v60, 0.0  ;;  %v208_v60 = vsel %vm78_vm0, %v877_v61, 0.0  ;;  %v281_v24 = vperm.slane %v250_v14, 1  ;;  %v350_v25 = vmul.f32 %v888_v8, %v335_v16 }
  0x7d   :  { %v202_v0 = vrot.slane %v201_v58, 4  ;;  %v209_v18 = vrot.slane %v208_v60, 4 }
  0x7f   :  { %v203_v13 = vadd.f32 %v202_v0, %v201_v58  ;;  %v967_v0 = vld [vmem:[#allocation6 + $0x4] ss:$8 sm:$0x3] }
  0x81   :  { %v555_v33 = vld.sshfl [vmem:[#allocation1] sm:$0xff pattern:$0x75316420]  ;;  %v556_v35 = vld.sshfl [vmem:[#allocation1 + $0x8] sm:$0xff pattern:$0x75316420] }
  0x82   :  { %v204_v23 = vrot.slane %v203_v13, 2 }
  0x83   :  { %493 = vrot.lane.b32.xlu2 %v482_v26, %s805_s29  ;;  %v559_v34 = vld.sshfl [vmem:[#allocation1 + $0x10] sm:$0xff pattern:$0x75316420]  ;;  %v560_v36 = vld.sshfl [vmem:[#allocation1 + $0x18] sm:$0xff pattern:$0x75316420]  ;;  %v349_v26 = vmul.f32 %v886_v7, %v334_v15 }
  0x84   :  { %528 = vrot.lane.b32.xlu1 %v520_v30, %s812_s6  ;;  %526 = vrot.lane.b32.xlu0 %v516_v29, %s812_s6  ;;  %v955_v30 = vld [vmem:[#allocation6 + $0x3] ss:$8 sm:$0x3]  ;;  %v218_v7 = vrot.slane %v217_v19, 2 }
  0x85   :  { %v385_v1 = vperm.slane %v955_v30, 1 }
  0x8b   :  { %530 = vrot.lane.b32.xlu2 %v517_v28, %s812_s6 }
  0x8c   :  { %532 = vrot.lane.b32.xlu0 %v521_v31, %s812_s6  ;;  %565 = vrot.lane.b32.xlu1 %v555_v33, %s813_s7  ;;  %v351_v31 = vmul.f32 %v891_v10, %v334_v15  ;;  %v352_v33 = vmul.f32 %v893_v11, %v335_v16  ;;  %v384_v11 = vperm.slane %v955_v30, 0  ;;  %v423_v15 = vperm.slane %v967_v0, 0 }
  0x8d   :  { %v462_v16 = vperm.slane %v970_v4, 0 }
  0x93   :  { %567 = vrot.lane.b32.xlu2 %v559_v34, %s813_s7  ;;  %v196_v34 = vadd.f32 %v195_v62, %v194_v5 }
  0x94   :  { %569 = vrot.lane.b32.xlu0 %v556_v35, %s813_s7  ;;  %571 = vrot.lane.b32.xlu1 %v560_v36, %s813_s7  ;;  %v210_v36 = vadd.f32 %v209_v18, %v208_v60 }
  0x95   :  { %v197_v5 = vrot.slane %v196_v34, 2 }
  0x96   :  { %v211_v60 = vrot.slane %v210_v36, 2 }
  0xa5   :  { %v306_v37 = vpop.permute.xlu2 %305 }
  0xad   :  { %v308_v43 = vpop.permute.xlu2 %307 }
  0xb4   :  { %v269_v39 = vpop.permute.xlu1 %268  ;;  %v265_v40 = vpop.permute.xlu0 %264 }
  0xb5   :  { %v275_v41 = vsel %vm274_vm3, %v265_v40, %v269_v39  ;;  %v277_v42 = vsel %vm274_vm3, %v269_v39, %v265_v40  ;;  %v918_v46 = vpop.permute.xlu2 %370  ;;  %v205_v40 = vadd.f32 %v204_v23, %v203_v13  ;;  %v219_v13 = vadd.f32 %v218_v7, %v217_v19 }
  0xb6   :  { %v150_v19 = vsel %vm78_vm0, %v856_v52, inf  ;;  %v463_v23 = vperm.slane %v970_v4, 1 }
  0xbc   :  { %v271_v44 = vpop.permute.xlu1 %270  ;;  %v267_v45 = vpop.permute.xlu0 %266 }
  0xbd   :  { %v920_v49 = vpop.permute.xlu2 %376  ;;  %v276_v10 = vsel %vm274_vm3, %v267_v45, %v271_v44 }
  0xc4   :  { %v312_v47 = vpop.permute.xlu1 %311  ;;  %v310_v48 = vpop.permute.xlu0 %309 }
  0xc5   :  { %v928_v63 = vpop.permute.xlu2 %413  ;;  %v314_v59 = vsel %vm313_vm4, %v306_v37, %v310_v48  ;;  %v316_v61 = vsel %vm313_vm4, %v310_v48, %v306_v37  ;;  %v317_v29 = vsel %vm313_vm4, %v312_v47, %v308_v43  ;;  %v315_v35 = vsel %vm313_vm4, %v308_v43, %v312_v47 }
  0xc6   :  { %v324_v8 = vmul.f32 %v320_v17, %v314_v59  ;;  %v278_v37 = vsel %vm274_vm3, %v271_v44, %v267_v45  ;;  %v323_v39 = vmul.f32 %v319_v21, %v316_v61  ;;  %v285_v48 = vmul.f32 %v281_v24, %v275_v41 }
  0xc7   :  { %v325_v58 = vmul.f32 %v319_v21, %v317_v29  ;;  %v284_v43 = vmul.f32 %v280_v20, %v277_v42  ;;  %v326_v47 = vmul.f32 %v320_v17, %v315_v35  ;;  %v286_v6 = vmul.f32 %v280_v20, %v278_v37  ;;  %v1004_v37 = vld [vmem:[#allocation6 + $0x6] ss:$8 sm:$0x3] }
  0xc8   :  { %v328_v12 = vadd.f32 %v324_v8, %v285_v48  ;;  %v287_v41 = vmul.f32 %v281_v24, %v276_v10  ;;  %v206_v44 = vrot.slane %v205_v40, 1  ;;  %v424_v42 = vperm.slane %v967_v0, 1 }
  0xc9   :  { %v327_v14 = vadd.f32 %v323_v39, %v284_v43  ;;  %v329_v45 = vadd.f32 %v325_v58, %v286_v6  ;;  %v143_v20 = vsel %vm78_vm0, %v854_v51, inf  ;;  %v198_v21 = vadd.f32 %v197_v5, %v196_v34 }
  0xca   :  { %v330_v18 = vadd.f32 %v326_v47, %v287_v41  ;;  %v354_v59 = vadd.f32 %v350_v25, %v328_v12  ;;  %v212_v61 = vadd.f32 %v211_v60, %v210_v36  ;;  %v220_v29 = vrot.slane %v219_v13, 1 }
  0xcb   :  { %v353_v30 = vadd.f32 %v349_v26, %v327_v14  ;;  %v207_v51 = vadd.f32 %v206_v44, %v205_v40  ;;  %v151_v34 = vrot.slane %v150_v19, 4  ;;  %v144_v8 = vrot.slane %v143_v20, 4 }
  0xcc   :  { %v922_v50 = vpop.permute.xlu1 %374  ;;  %v355_v36 = vadd.f32 %v351_v31, %v329_v45  ;;  %v356_v7 = vadd.f32 %v352_v33, %v330_v18  ;;  %v213_v48 = vrot.slane %v212_v61, 1  ;;  %v1008_v10 = vadd.f32 %v220_v29, %v219_v13  ;;  %v1040_v18 = vld [vmem:[#allocation6 + $0x7] ss:$8 sm:$0x3] }
  0xcd   :  { %v943_v22 = vpop.permute.xlu2 %450  ;;  %v379_v35 = vsel %vm378_vm5, %v918_v46, %v922_v50  ;;  %v381_v52 = vsel %vm378_vm5, %v922_v50, %v918_v46  ;;  %v199_v46 = vrot.slane %v198_v21, 1  ;;  %v157_v50 = vsel %vm78_vm0, %v861_v54, inf }
  0xce   :  { %v924_v57 = vpop.permute.xlu0 %372  ;;  %v388_v39 = vmul.f32 %v384_v11, %v379_v35  ;;  %v389_v40 = vmul.f32 %v385_v1, %v381_v52  ;;  %715 = vrcp.f32 %v207_v51  ;;  %v501_v31 = vperm.slane %v1004_v37, 0 }
  0xcf   :  { %v380_v25 = vsel %vm378_vm5, %v924_v57, %v920_v49  ;;  %v382_v26 = vsel %vm378_vm5, %v920_v49, %v924_v57  ;;  %v164_v49 = vsel %vm78_vm0, %v865_v56, inf  ;;  %v152_v47 = vmin.f32 %v150_v19, %v151_v34 }
  0xd0   :  { %v390_v58 = vmul.f32 %v384_v11, %v380_v25  ;;  %v391_v43 = vmul.f32 %v385_v1, %v382_v26  ;;  %v145_v5 = vmin.f32 %v143_v20, %v144_v8  ;;  %v158_v54 = vrot.slane %v157_v50, 4 }
  0xd1   :  { %v502_v56 = vperm.slane %v1004_v37, 1  ;;  %v1026_v1 = vadd.f32 %v199_v46, %v198_v21  ;;  %v165_v60 = vrot.slane %v164_v49, 4  ;;  %v1032_v13 = vadd.f32 %v213_v48, %v212_v61  ;;  %v1063_v46 = vld [vmem:[#allocation6 + $0x10] ss:$8 sm:$0x3] }
  0xd2   :  { %717 = vrcp.f32 %v1008_v10  ;;  %v392_v41 = vadd.f32 %v388_v39, %v353_v30  ;;  %v393_v14 = vadd.f32 %v389_v40, %v354_v59  ;;  %v394_v44 = vadd.f32 %v390_v58, %v355_v36 }
  0xd3   :  { %v395_v45 = vadd.f32 %v391_v43, %v356_v7  ;;  %v153_v19 = vrot.slane %v152_v47, 2  ;;  %v146_v20 = vrot.slane %v145_v5, 2  ;;  %v159_v21 = vmin.f32 %v157_v50, %v158_v54 }
  0xd4   :  { %v716_v61 = vpop.eup %715  ;;  %719 = vrcp.f32 %v1026_v1  ;;  %v166_v35 = vmin.f32 %v164_v49, %v165_v60  ;;  %v541_v25 = vperm.slane %v1040_v18, 1 }
  0xd5   :  { %v985_v24 = vpop.permute.xlu2 %487  ;;  %721 = vrcp.f32 %v1032_v13  ;;  %v154_v36 = vmin.f32 %v152_v47, %v153_v19  ;;  %v227_v7 = vmul.f32 %v716_v61, %v207_v51  ;;  %v579_v47 = vperm.slane %v1063_v46, 0 }
  0xd6   :  { %v932_v2 = vpop.permute.xlu1 %411  ;;  %v934_v3 = vpop.permute.xlu0 %409  ;;  %v167_v58 = vrot.slane %v166_v35, 2 }
  0xd7   :  { %v418_v6 = vsel %vm417_vm6, %v934_v3, %v928_v63  ;;  %v420_v11 = vsel %vm417_vm6, %v928_v63, %v934_v3 }
  0xd8   :  { %v427_v29 = vmul.f32 %v423_v15, %v418_v6  ;;  %v428_v59 = vmul.f32 %v424_v42, %v420_v11  ;;  %v718_v26 = vpop.eup %717 }
  0xd9   :  { %v229_v54 = vmul.f32 %v718_v26, %v1008_v10 }
  0xda   :  { %v431_v39 = vadd.f32 %v427_v29, %v392_v41  ;;  %v432_v40 = vadd.f32 %v428_v59, %v393_v14  ;;  %v720_v43 = vpop.eup %719  ;;  %v155_v14 = vrot.slane %v154_v36, 1 }
  0xdb   :  { %v722_v6 = vpop.eup %721  ;;  %v226_v4 = vmul.f32 %v720_v43, %v1026_v1 }
  0xdc   :  { %v228_v19 = vmul.f32 %v722_v6, %v1032_v13 }
  0xdd   :  { %v494_v3 = vpop.permute.xlu2 %493 }
  0xde   :  { %v949_v27 = vpop.permute.xlu0 %415  ;;  %v951_v28 = vpop.permute.xlu1 %448 }
  0xdf   :  { %v419_v12 = vsel %vm417_vm6, %v932_v2, %v949_v27  ;;  %v421_v63 = vsel %vm417_vm6, %v949_v27, %v932_v2 }
  0xe0   :  { %v429_v30 = vmul.f32 %v423_v15, %v419_v12  ;;  %v430_v52 = vmul.f32 %v424_v42, %v421_v63  ;;  %v540_v15 = vperm.slane %v1040_v18, 0 }
  0xe2   :  { %v433_v48 = vadd.f32 %v429_v30, %v394_v44  ;;  %v434_v49 = vadd.f32 %v430_v52, %v395_v45  ;;  %v230_v52 = vsub.f32 2.0, %v226_v4 }
  0xe6   :  { %v976_v62 = vpop.permute.xlu0 %452  ;;  %v978_v17 = vpop.permute.xlu1 %454 }
  0xe7   :  { %v457_v2 = vsel %vm456_vm7, %v951_v28, %v976_v62  ;;  %v459_v27 = vsel %vm456_vm7, %v976_v62, %v951_v28  ;;  %v147_v28 = vmin.f32 %v145_v5, %v146_v20  ;;  %v160_v62 = vrot.slane %v159_v21, 2 }
  0xe8   :  { %v466_v50 = vmul.f32 %v462_v16, %v459_v27  ;;  %v467_v0 = vmul.f32 %v463_v23, %v457_v2  ;;  %v458_v42 = vsel %vm456_vm7, %v943_v22, %v978_v17  ;;  %v460_v51 = vsel %vm456_vm7, %v978_v17, %v943_v22 }
  0xe9   :  { %v580_v5 = vperm.slane %v1063_v46, 1  ;;  %v468_v11 = vmul.f32 %v462_v16, %v460_v51  ;;  %v469_v12 = vmul.f32 %v463_v23, %v458_v42  ;;  %v231_v22 = vsub.f32 2.0, %v227_v7  ;;  %v531_v16 = vpop.permute.xlu2 %530 }
  0xea   :  { %v161_v17 = vmin.f32 %v159_v21, %v160_v62  ;;  %v470_v60 = vadd.f32 %v466_v50, %v431_v39  ;;  %v471_v41 = vadd.f32 %v467_v0, %v432_v40  ;;  %v148_v44 = vrot.slane %v147_v28, 1 }
  0xeb   :  { %v168_v23 = vmin.f32 %v166_v35, %v167_v58  ;;  %v233_v20 = vsub.f32 2.0, %v229_v54  ;;  %v472_v21 = vadd.f32 %v468_v11, %v433_v48  ;;  %v473_v29 = vadd.f32 %v469_v12, %v434_v49 }
  0xec   :  { %v235_v59 = vmul.f32 %v716_v61, %v231_v22  ;;  %v162_v30 = vrot.slane %v161_v17, 1  ;;  %v232_v7 = vsub.f32 2.0, %v228_v19  ;;  %v156_v51 = vmin.f32 %v154_v36, %v155_v14 }
  0xed   :  { %v237_v62 = vmul.f32 %v718_v26, %v233_v20  ;;  %v149_v40 = vmin.f32 %v147_v28, %v148_v44  ;;  %v234_v12 = vmul.f32 %v720_v43, %v230_v52 }
  0xee   :  { %v1012_v57 = vpop.permute.xlu0 %489  ;;  %v1015_v33 = vpop.permute.xlu1 %491  ;;  %v242_v39 = vrot.slane %v235_v59, 4  ;;  %v163_v48 = vmin.f32 %v161_v17, %v162_v30  ;;  %vm172_vm11 = vcmp.eq.f32.partialorder %v849_v32, %v156_v51 }
  0xef   :  { %v496_v45 = vsel %vm495_vm8, %v985_v24, %v1015_v33  ;;  %v498_v10 = vsel %vm495_vm8, %v1015_v33, %v985_v24  ;;  %v497_v63 = vsel %vm495_vm8, %v1012_v57, %v494_v3  ;;  %v499_v18 = vsel %vm495_vm8, %v494_v3, %v1012_v57 }
  0xf0   :  { %v505_v13 = vmul.f32 %v501_v31, %v498_v10  ;;  %v506_v3 = vmul.f32 %v502_v56, %v496_v45  ;;  %v507_v61 = vmul.f32 %v501_v31, %v499_v18  ;;  %v508_v35 = vmul.f32 %v502_v56, %v497_v63 }
  0xf1   :  { %v568_v31 = vpop.permute.xlu2 %567  ;;  %v236_v56 = vmul.f32 %v722_v6, %v232_v7  ;;  %v243_v22 = vrot.slane %v237_v62, 4  ;;  %v244_v14 = vsel %vm78_vm0, %v234_v12, %v242_v39  ;;  %vm171_vm13 = vcmp.eq.f32.partialorder %v849_v32, %v149_v40 }
  0xf2   :  { %v509_v58 = vadd.f32 %v505_v13, %v470_v60  ;;  %v510_v49 = vadd.f32 %v506_v3, %v471_v41  ;;  %v511_v54 = vadd.f32 %v507_v61, %v472_v21  ;;  %v512_v11 = vadd.f32 %v508_v35, %v473_v29 }
  0xf3   :  { %v245_v38 = vsel %vm78_vm0, %v236_v56, %v243_v22  ;;  %vm173_vm14 = vcmp.eq.f32.partialorder %v849_v32, %v163_v48 }
  0xf6   :  { %v529_v34 = vpop.permute.xlu1 %528  ;;  %v527_v8 = vpop.permute.xlu0 %526 }
  0xf7   :  { %v535_v1 = vsel %vm534_vm9, %v527_v8, %v531_v16  ;;  %v537_v2 = vsel %vm534_vm9, %v531_v16, %v527_v8  ;;  %v169_v8 = vrot.slane %v168_v23, 1 }
  0xf8   :  { %v544_v50 = vmul.f32 %v540_v15, %v535_v1  ;;  %v545_v0 = vmul.f32 %v541_v25, %v537_v2 }
  0xf9   :  { %v170_v37 = vmin.f32 %v168_v23, %v169_v8 }
  0xfa   :  { %v548_v45 = vadd.f32 %v544_v50, %v509_v58  ;;  %v549_v10 = vadd.f32 %v545_v0, %v510_v49 }
  0xfb   :  { %vm174_vm12 = vcmp.eq.f32.partialorder %v849_v32, %v170_v37 }
  0xfe   :  { %v533_v24 = vpop.permute.xlu0 %532  ;;  %v566_v33 = vpop.permute.xlu1 %565 }
  0xff   :  { %v536_v27 = vsel %vm534_vm9, %v529_v34, %v533_v24  ;;  %v538_v57 = vsel %vm534_vm9, %v533_v24, %v529_v34 }
 0x100   :  { %v546_v42 = vmul.f32 %v540_v15, %v536_v27  ;;  %v547_v34 = vmul.f32 %v541_v25, %v538_v57 }
 0x102   :  { %v550_v26 = vadd.f32 %v546_v42, %v511_v54  ;;  %v551_v16 = vadd.f32 %v547_v34, %v512_v11 }
 0x106   :  { %v570_v4 = vpop.permute.xlu0 %569  ;;  %v572_v15 = vpop.permute.xlu1 %571 }
 0x107   :  { %v574_v25 = vsel %vm573_vm10, %v566_v33, %v570_v4  ;;  %v576_v36 = vsel %vm573_vm10, %v570_v4, %v566_v33  ;;  %v575_v28 = vsel %vm573_vm10, %v568_v31, %v572_v15  ;;  %v577_v43 = vsel %vm573_vm10, %v572_v15, %v568_v31 }
 0x108   :  { %v583_v6 = vmul.f32 %v579_v47, %v574_v25  ;;  %v584_v17 = vmul.f32 %v580_v5, %v576_v36  ;;  %v585_v60 = vmul.f32 %v579_v47, %v575_v28  ;;  %v586_v41 = vmul.f32 %v580_v5, %v577_v43 }
 0x109   :  { %v248_v47 = vmul.f32 %v858_v53, %v244_v14  ;;  %v249_v5 = vmul.f32 %v863_v55, %v245_v38 }
 0x10a   :  { %v587_v44 = vadd.f32 %v583_v6, %v548_v45  ;;  %v588_v23 = vadd.f32 %v584_v17, %v549_v10  ;;  %v589_v63 = vadd.f32 %v585_v60, %v550_v26  ;;  %v590_v18 = vadd.f32 %v586_v41, %v551_v16 }
 0x10c   :  { %v592_v46 = vsel %vm172_vm11, %v588_v23, 1.0  ;;  %v594_v19 = vsel %vm174_vm12, %v590_v18, 1.0  ;;  %v591_v29 = vsel %vm171_vm13, %v587_v44, 1.0  ;;  %v593_v24 = vsel %vm173_vm14, %v589_v63, 1.0 }
 0x10d   :  { %v599_v20 = vrot.slane %v592_v46, 4  ;;  %v600_v21 = vrot.slane %v594_v19, 4 }
 0x10f   :  { %v601_v33 = vsel %vm78_vm0, %v591_v29, %v599_v20  ;;  %v602_v59 = vsel %vm78_vm0, %v593_v24, %v600_v21 }
 0x110   :  { %v605_v30 = vmul.f32 %v601_v33, %v248_v47  ;;  %v606_v1 = vmul.f32 %v602_v59, %v249_v5 }
 0x112   :  { %609 = vst [vmem:[#allocation1] ss:$2 sm:$0xff] %v605_v30 }
 0x113   :  { %613 = vst [vmem:[#allocation1 + $0x10] ss:$2 sm:$0xff] %v606_v1 }
 0x119   :  { %v610_v2 = vld.sshfl [vmem:[#allocation1] sm:$0xff pattern:$0x75316420]  ;;  %v611_v32 = vld.sshfl [vmem:[#allocation1 + $0x8] sm:$0xff pattern:$0x75316420] }
 0x11a   :  { %620 = vst [vmem:[%s1169_s3] sm:$0xf] %v610_v2  ;;  %v614_v53 = vld.sshfl [vmem:[#allocation1 + $0x10] sm:$0xff pattern:$0x75316420] }
 0x11b   :  { %621 = vst [vmem:[%s1169_s3 + $0x8] sm:$0xf] %v611_v32  ;;  %v615_v55 = vld.sshfl [vmem:[#allocation1 + $0x18] sm:$0xff pattern:$0x75316420] }
 0x11c   :  { %624 = vst [vmem:[#allocation1] ss:$2 sm:$0xff] %v605_v30 }
 0x11d   :  { %622 = vst [vmem:[%s1169_s3 + $0x10] sm:$0xf] %v614_v53 }
 0x11e   :  { %623 = vst [vmem:[%s1169_s3 + $0x18] sm:$0xf] %v615_v55 }
 0x11f   :  { %628 = vst [vmem:[#allocation1 + $0x10] ss:$2 sm:$0xff] %v606_v1 }
 0x123   :  { %v625_v27 = vld.sshfl [vmem:[#allocation1] sm:$0xff pattern:$0x75316420]  ;;  %v626_v57 = vld.sshfl [vmem:[#allocation1 + $0x8] sm:$0xff pattern:$0x75316420] }
 0x124   :  { %v635_v13 = vsel %vm78_vm0, %v625_v27, 0.0  ;;  %v642_v3 = vsel %vm78_vm0, %v626_v57, 0.0 }
 0x125   :  { %v636_v61 = vrot.slane %v635_v13, 4  ;;  %v643_v35 = vrot.slane %v642_v3, 4 }
 0x126   :  { %v629_v52 = vld.sshfl [vmem:[#allocation1 + $0x10] sm:$0xff pattern:$0x75316420]  ;;  %v630_v8 = vld.sshfl [vmem:[#allocation1 + $0x18] sm:$0xff pattern:$0x75316420] }
 0x127   :  { %v637_v7 = vadd.f32 %v636_v61, %v635_v13  ;;  %v644_v62 = vadd.f32 %v643_v35, %v642_v3  ;;  %v649_v50 = vsel %vm78_vm0, %v629_v52, 0.0  ;;  %v656_v0 = vsel %vm78_vm0, %v630_v8, 0.0 }
 0x128   :  { %v650_v42 = vrot.slane %v649_v50, 4  ;;  %v657_v34 = vrot.slane %v656_v0, 4  ;;  %vm680_vm0 = vcmp.lt.s32.totalorder %v107_v9, 256 }
 0x129   :  { %v638_v51 = vrot.slane %v637_v7, 2  ;;  %v645_v39 = vrot.slane %v644_v62, 2 }
 0x12a   :  { %v651_v40 = vadd.f32 %v650_v42, %v649_v50  ;;  %v658_v48 = vadd.f32 %v657_v34, %v656_v0 }
 0x12b   :  { %v639_v58 = vadd.f32 %v638_v51, %v637_v7  ;;  %v646_v49 = vadd.f32 %v645_v39, %v644_v62 }
 0x12c   :  { %v652_v54 = vrot.slane %v651_v40, 2  ;;  %v659_v11 = vrot.slane %v658_v48, 2 }
 0x12d   :  { %v640_v31 = vrot.slane %v639_v58, 1  ;;  %v647_v12 = vrot.slane %v646_v49, 1 }
 0x12e   :  { %v653_v37 = vadd.f32 %v652_v54, %v651_v40  ;;  %v660_v56 = vadd.f32 %v659_v11, %v658_v48 }
 0x12f   :  { %v641_v22 = vadd.f32 %v640_v31, %v639_v58  ;;  %v648_v45 = vadd.f32 %v647_v12, %v646_v49 }
 0x130   :  { %v654_v10 = vrot.slane %v653_v37, 1  ;;  %v661_v26 = vrot.slane %v660_v56, 1 }
 0x131   :  { %v664_v16 = vsub.f32 1.0, %v648_v45  ;;  %v663_v25 = vsub.f32 1.0, %v641_v22 }
 0x132   :  { %v655_v4 = vadd.f32 %v654_v10, %v653_v37  ;;  %v662_v15 = vadd.f32 %v661_v26, %v660_v56 }
 0x133   :  { %v671_v36 = vrot.slane %v664_v16, 7 }
 0x134   :  { %v666_v28 = vsub.f32 1.0, %v662_v15  ;;  %v665_v6 = vsub.f32 1.0, %v655_v4 }
 0x135   :  { %v674_v43 = vsel %vm673_vm15, %v663_v25, %v671_v36 }
 0x136   :  { %694 = vst.msk [vmem:[%s1169_s3 + $0x4] ss:$8 sm:$0x3] %vm680_vm0, %v674_v43  ;;  %v672_v17 = vrot.slane %v666_v28, 7 }
 0x138   :  { %v675_v60 = vsel %vm673_vm15, %v665_v6, %v672_v17 }
 0x139   :  { %695 = vst.msk [vmem:[%s1169_s3 + $0x14] ss:$8 sm:$0x3] %vm680_vm0, %v675_v60 }
 0x13a   :  { %692 = vsyncpa [#allocation3], 1 }
 0x13b   :  { %693 = vsyncpa [#allocation5], 1 }

</bundles_post_ra>
